<compile_context>
chip_gen: v7x
topology: tpu7x:2x2x1
jax: 0.10.0
libtpu: 0.0.40
codegen_flags: <defaults>
</compile_context>

<pallas_src>
import jax
import jax.numpy as jnp
from jax.experimental import pallas as pl
from jax.experimental.pallas import tpu as pltpu


def _round_up(n, m):
    return (n + m - 1) // m * m


def qnet_kernel(x_ref, w1_ref, b1_ref, w2_ref, b2_ref, w3_ref, b3_ref, out_ref):
    # One batch tile; all intermediates stay on-chip (never touch HBM).
    x = x_ref[...]
    h1 = jnp.dot(x, w1_ref[...], preferred_element_type=jnp.float32) + b1_ref[...]
    h1 = jnp.maximum(h1, 0.0).astype(w2_ref.dtype)
    h2 = jnp.dot(h1, w2_ref[...], preferred_element_type=jnp.float32) + b2_ref[...]
    h2 = jnp.maximum(h2, 0.0).astype(w3_ref.dtype)
    q = jnp.dot(h2, w3_ref[...], preferred_element_type=jnp.float32) + b3_ref[...]
    out_ref[...] = q.astype(out_ref.dtype)


def qnet_forward(x, params, *, block_batch=256, compute_dtype=jnp.bfloat16):
    """x: (batch, num_inputs) f32. params: dict of w1,b1,w2,b2,w3,b3 (f32)."""
    batch, num_inputs = x.shape
    hidden = params["w1"].shape[1]
    num_outputs = params["w3"].shape[1]

    # ---- Lane-dense output: pad fc3 columns to a multiple of 128 lanes. ----
    out_pad = _round_up(max(num_outputs, 1), 128)
    w3 = jnp.pad(params["w3"], ((0, 0), (0, out_pad - num_outputs)))
    b3 = jnp.pad(params["b3"], ((0, 0), (0, out_pad - num_outputs)))

    # ---- Batch tile: multiple of 8 sublanes, capped at block_batch. ----
    tb = min(block_batch, _round_up(batch, 8))
    padded_batch = _round_up(batch, tb)
    if padded_batch != batch:
        x = jnp.pad(x, ((0, padded_batch - batch), (0, 0)))

    # ---- bf16 matmul operands; biases / accumulation / ReLU stay f32. ----
    xc = x.astype(compute_dtype)
    w1 = params["w1"].astype(compute_dtype)
    w2 = params["w2"].astype(compute_dtype)
    w3 = w3.astype(compute_dtype)
    b1 = params["b1"].astype(jnp.float32)
    b2 = params["b2"].astype(jnp.float32)
    b3 = b3.astype(jnp.float32)

    grid = (padded_batch // tb,)

    def resident(shape):  # full-shape block, same block every grid step
        return pl.BlockSpec(shape, lambda i: (0, 0))

    q_padded = pl.pallas_call(
        qnet_kernel,
        out_shape=jax.ShapeDtypeStruct((padded_batch, out_pad), jnp.float32),
        grid=grid,
        in_specs=[
            pl.BlockSpec((tb, num_inputs), lambda i: (i, 0)),   # x: tiled over batch
            resident((num_inputs, hidden)),                     # w1 (resident)
            resident((1, hidden)),                              # b1
            resident((hidden, hidden)),                         # w2
            resident((1, hidden)),                              # b2
            resident((hidden, out_pad)),                        # w3 (padded cols)
            resident((1, out_pad)),                             # b3 (padded cols)
        ],
        out_specs=pl.BlockSpec((tb, out_pad), lambda i: (i, 0)),
        compiler_params=pltpu.CompilerParams(
            dimension_semantics=("parallel",)),
    )(xc, w1, b1, w2, b2, w3, b3)

    return q_padded[:batch, :num_outputs]


# ---------------- parameter init (matches PyTorch QNet) ----------------

def xavier_uniform(key, fan_in, fan_out, dtype=jnp.float32):
    # torch.nn.init.xavier_uniform_ (gain=1.0) on a (fan_in, fan_out) layout.
    limit = jnp.sqrt(6.0 / (fan_in + fan_out))
    return jax.random.uniform(key, (fan_in, fan_out), dtype,
                              minval=-limit, maxval=limit)


def linear_bias(key, fan_in, fan_out, dtype=jnp.float32):
    # PyTorch nn.Linear default bias init: U(-1/sqrt(fan_in), 1/sqrt(fan_in)).
    bound = 1.0 / jnp.sqrt(jnp.float32(fan_in))
    return jax.random.uniform(key, (1, fan_out), dtype,
                              minval=-bound, maxval=bound)


def init_qnet_params(key, num_inputs, num_outputs, hidden=128):
    k = jax.random.split(key, 6)
    return {
        "w1": xavier_uniform(k[0], num_inputs, hidden),
        "b1": linear_bias(k[1], num_inputs, hidden),
        "w2": xavier_uniform(k[2], hidden, hidden),
        "b2": linear_bias(k[3], hidden, hidden),
        "w3": xavier_uniform(k[4], hidden, num_outputs),
        "b3": linear_bias(k[5], hidden, num_outputs),
    }


def qnet_ref(x, p):
    h1 = jnp.maximum(x @ p["w1"] + p["b1"], 0.0)
    h2 = jnp.maximum(h1 @ p["w2"] + p["b2"], 0.0)
    return h2 @ p["w3"] + p["b3"]


if __name__ == "__main__":
    key = jax.random.PRNGKey(0)
    k_param, k_x = jax.random.split(key)

    batch, num_inputs, num_outputs = 8, 4, 2  # CartPole-like DQN sizes
    params = init_qnet_params(k_param, num_inputs, num_outputs)
    x = jax.random.normal(k_x, (batch, num_inputs), jnp.float32)

    q = qnet_forward(x, params)
    q = jax.block_until_ready(q)

    q_ref = qnet_ref(x, params)
    assert q.shape == (batch, num_outputs)
    # bf16 matmul inputs with f32 accumulation -> relaxed tolerance vs f32 ref.
    assert jnp.allclose(q, q_ref, atol=2e-2, rtol=2e-2)
    print("KERNEL_OK")
</pallas_src>

<mosaic_0001>
module attributes {stable_mosaic.version = 11 : i64} {
  func.func @qnet_kernel(%arg0: i32, %arg1: memref<8x4xbf16, #tpu.memory_space<vmem>>, %arg2: memref<4x128xbf16, #tpu.memory_space<vmem>>, %arg3: memref<1x128xf32, #tpu.memory_space<vmem>>, %arg4: memref<128x128xbf16, #tpu.memory_space<vmem>>, %arg5: memref<1x128xf32, #tpu.memory_space<vmem>>, %arg6: memref<128x128xbf16, #tpu.memory_space<vmem>>, %arg7: memref<1x128xf32, #tpu.memory_space<vmem>>, %arg8: memref<8x128xf32, #tpu.memory_space<vmem>>) attributes {dimension_semantics = [#tpu.dimension_semantics<parallel>], iteration_bounds = array<i64: 1>, scalar_prefetch = 0 : i64, scratch_operands = 0 : i64, tpu.core_type = #tpu.core_type<tc>, window_params = [{transform_indices = @transform_0, window_bounds = array<i64: 8, 4>}, {pipeline_mode = #tpu.pipeline_mode<synchronous>, transform_indices = @transform_1, window_bounds = array<i64: 4, 128>}, {pipeline_mode = #tpu.pipeline_mode<synchronous>, transform_indices = @transform_2, window_bounds = array<i64: 1, 128>}, {pipeline_mode = #tpu.pipeline_mode<synchronous>, transform_indices = @transform_3, window_bounds = array<i64: 128, 128>}, {pipeline_mode = #tpu.pipeline_mode<synchronous>, transform_indices = @transform_4, window_bounds = array<i64: 1, 128>}, {pipeline_mode = #tpu.pipeline_mode<synchronous>, transform_indices = @transform_5, window_bounds = array<i64: 128, 128>}, {pipeline_mode = #tpu.pipeline_mode<synchronous>, transform_indices = @transform_6, window_bounds = array<i64: 1, 128>}, {transform_indices = @transform_7, window_bounds = array<i64: 8, 128>}]} {
    %c0 = arith.constant 0 : index
    %c0_0 = arith.constant 0 : index
    %0 = vector.load %arg1[%c0, %c0_0] : memref<8x4xbf16, #tpu.memory_space<vmem>>, vector<8x4xbf16>
    %c0_1 = arith.constant 0 : index
    %c0_2 = arith.constant 0 : index
    %1 = vector.load %arg2[%c0_1, %c0_2] : memref<4x128xbf16, #tpu.memory_space<vmem>>, vector<4x128xbf16>
    %cst = arith.constant dense<0.000000e+00> : vector<8x128xf32>
    %2 = tpu.matmul %0, %1, %cst {dimension_numbers = #tpu.dot_dimension_numbers<[1], [0], [0], [1], [0, 0, 1, 1], [], []>} : vector<8x4xbf16>, vector<4x128xbf16>, vector<8x128xf32> -> vector<8x128xf32>
    %c0_3 = arith.constant 0 : index
    %c0_4 = arith.constant 0 : index
    %3 = vector.load %arg3[%c0_3, %c0_4] : memref<1x128xf32, #tpu.memory_space<vmem>>, vector<1x128xf32>
    %4 = vector.broadcast %3 : vector<1x128xf32> to vector<8x128xf32>
    %5 = arith.addf %2, %4 : vector<8x128xf32>
    %cst_5 = arith.constant 0.000000e+00 : f32
    %6 = vector.broadcast %cst_5 : f32 to vector<8x128xf32>
    %7 = arith.maximumf %5, %6 : vector<8x128xf32>
    %8 = arith.truncf %7 : vector<8x128xf32> to vector<8x128xbf16>
    %c0_6 = arith.constant 0 : index
    %c0_7 = arith.constant 0 : index
    %9 = vector.load %arg4[%c0_6, %c0_7] : memref<128x128xbf16, #tpu.memory_space<vmem>>, vector<128x128xbf16>
    %cst_8 = arith.constant dense<0.000000e+00> : vector<8x128xf32>
    %10 = tpu.matmul %8, %9, %cst_8 {dimension_numbers = #tpu.dot_dimension_numbers<[1], [0], [0], [1], [0, 0, 1, 1], [], []>} : vector<8x128xbf16>, vector<128x128xbf16>, vector<8x128xf32> -> vector<8x128xf32>
    %c0_9 = arith.constant 0 : index
    %c0_10 = arith.constant 0 : index
    %11 = vector.load %arg5[%c0_9, %c0_10] : memref<1x128xf32, #tpu.memory_space<vmem>>, vector<1x128xf32>
    %12 = vector.broadcast %11 : vector<1x128xf32> to vector<8x128xf32>
    %13 = arith.addf %10, %12 : vector<8x128xf32>
    %cst_11 = arith.constant 0.000000e+00 : f32
    %14 = vector.broadcast %cst_11 : f32 to vector<8x128xf32>
    %15 = arith.maximumf %13, %14 : vector<8x128xf32>
    %16 = arith.truncf %15 : vector<8x128xf32> to vector<8x128xbf16>
    %c0_12 = arith.constant 0 : index
    %c0_13 = arith.constant 0 : index
    %17 = vector.load %arg6[%c0_12, %c0_13] : memref<128x128xbf16, #tpu.memory_space<vmem>>, vector<128x128xbf16>
    %cst_14 = arith.constant dense<0.000000e+00> : vector<8x128xf32>
    %18 = tpu.matmul %16, %17, %cst_14 {dimension_numbers = #tpu.dot_dimension_numbers<[1], [0], [0], [1], [0, 0, 1, 1], [], []>} : vector<8x128xbf16>, vector<128x128xbf16>, vector<8x128xf32> -> vector<8x128xf32>
    %c0_15 = arith.constant 0 : index
    %c0_16 = arith.constant 0 : index
    %19 = vector.load %arg7[%c0_15, %c0_16] : memref<1x128xf32, #tpu.memory_space<vmem>>, vector<1x128xf32>
    %20 = vector.broadcast %19 : vector<1x128xf32> to vector<8x128xf32>
    %21 = arith.addf %18, %20 : vector<8x128xf32>
    %c0_17 = arith.constant 0 : index
    %c0_18 = arith.constant 0 : index
    %22 = vector.load %arg8[%c0_17, %c0_18] : memref<8x128xf32, #tpu.memory_space<vmem>>, vector<8x128xf32>
    tpu.vector_store %arg8[%c0_17, %c0_18], %21 {strides = array<i32>} : memref<8x128xf32, #tpu.memory_space<vmem>>, vector<8x128xf32>,
    return
  }
  func.func @transform_0(%arg0: i32) -> (i32, i32) {
    %c0_i32 = arith.constant 0 : i32
    %c0_i32_0 = arith.constant 0 : i32
    return %arg0, %c0_i32 : i32, i32
  }
  func.func @transform_1(%arg0: i32) -> (i32, i32) {
    %c0_i32 = arith.constant 0 : i32
    %c0_i32_0 = arith.constant 0 : i32
    %c0_i32_1 = arith.constant 0 : i32
    return %c0_i32, %c0_i32_0 : i32, i32
  }
  func.func @transform_2(%arg0: i32) -> (i32, i32) {
    %c0_i32 = arith.constant 0 : i32
    %c0_i32_0 = arith.constant 0 : i32
    %c0_i32_1 = arith.constant 0 : i32
    return %c0_i32, %c0_i32_0 : i32, i32
  }
  func.func @transform_3(%arg0: i32) -> (i32, i32) {
    %c0_i32 = arith.constant 0 : i32
    %c0_i32_0 = arith.constant 0 : i32
    %c0_i32_1 = arith.constant 0 : i32
    return %c0_i32, %c0_i32_0 : i32, i32
  }
  func.func @transform_4(%arg0: i32) -> (i32, i32) {
    %c0_i32 = arith.constant 0 : i32
    %c0_i32_0 = arith.constant 0 : i32
    %c0_i32_1 = arith.constant 0 : i32
    return %c0_i32, %c0_i32_0 : i32, i32
  }
  func.func @transform_5(%arg0: i32) -> (i32, i32) {
    %c0_i32 = arith.constant 0 : i32
    %c0_i32_0 = arith.constant 0 : i32
    %c0_i32_1 = arith.constant 0 : i32
    return %c0_i32, %c0_i32_0 : i32, i32
  }
  func.func @transform_6(%arg0: i32) -> (i32, i32) {
    %c0_i32 = arith.constant 0 : i32
    %c0_i32_0 = arith.constant 0 : i32
    %c0_i32_1 = arith.constant 0 : i32
    return %c0_i32, %c0_i32_0 : i32, i32
  }
  func.func @transform_7(%arg0: i32) -> (i32, i32) {
    %c0_i32 = arith.constant 0 : i32
    %c0_i32_0 = arith.constant 0 : i32
    return %arg0, %c0_i32 : i32, i32
  }
}

</mosaic_0001>

<bundles_post_ra>
// kernel: tpu_custom_call.1
= control target key start
LH: loop header
LB: loop body
LE: loop exit
PB: predicated region body
PF: predicated region fallthrough
CT: control target
= control target key end

     0   :  { %12 = vsyncpa [#allocation3], 0  ;;  %s658_s0 = inlined_call_operand.vmem [shape: bf16[8,4], index: 0, kind: input, shape index: {}]   ;;  %s659_s1 = inlined_call_operand.vmem [shape: bf16[4,128], index: 1, kind: input, shape index: {}]   ;;  %s660_s2 = inlined_call_operand.vmem [shape: f32[1,128], index: 2, kind: input, shape index: {}]   ;;  %s661_s3 = inlined_call_operand.hbm [shape: bf16[128,128], index: 3, kind: input, shape index: {}]   ;;  %s662_s4 = inlined_call_operand.vmem [shape: f32[1,128], index: 4, kind: input, shape index: {}]   ;;  %s663_s5 = inlined_call_operand.hbm [shape: bf16[128,128], index: 5, kind: input, shape index: {}]   ;;  %s664_s6 = inlined_call_operand.vmem [shape: f32[1,128], index: 6, kind: input, shape index: {}]   ;;  %s665_s7 = inlined_call_operand.hbm [shape: f32[8,128], index: 7, kind: output, shape index: {}]  }
   0x1   :  { %13 = vsyncpa [#allocation6], 0 }
   0x2   :  { %14 = vsyncpa [#allocation4], 0  ;;  %s537_s24 = smov [#allocation2]   ;;  %s465_s28 = scalar_lea.hbm %s661_s3, 1024 }
   0x3   :  { %s26_s25 = sshll.u32 %s537_s24, 4  ;;  %p466_p0 = scmp.ne.s32.totalorder %s661_s3, %s465_s28  ;;  %s27_s25 = int_to_ptr.vmem [resolvable:$true] %s26_s25 }
   0x4   :  { %p469_p1 = scmp.lt.u32.totalorder %s465_s28, %s661_s3 }
   0x6   :  { %p471_p2 = pnand %p469_p1, %p466_p0 }
   0x8   :  { %474 = shalt.err (!%p471_p2)
}
   0x9   :  { %s475_s10 = scalar_lea.vmem %s27_s25, 1024  ;;  %p480_p4 = scmp.lt.s32.totalorder %s27_s25, %s27_s25 }
   0xa   :  { %p476_p3 = scmp.ne.s32.totalorder %s27_s25, %s475_s10  ;;  %p481_p5 = scmp.lt.s32.totalorder %s475_s10, %s475_s10 }
   0xc   :  { %p482_p6 = por %p481_p5, %p480_p4 }
   0xe   :  { %p483_p7 = pnand %p482_p6, %p476_p3 }
  0x10   :  { %486 = shalt.err (!%p483_p7)
}
  0x11   :  { %s538_s11 = smov 64   ;;  %s539_s12 = smov 4  }
  0x12   :  { %32 = dma.hbm_to_vmem [thread:$0]  %s661_s3, 1024, %s27_s25, [#allocation3], %s538_s11, %s538_s11, %s539_s12  }
  0x13   :  { %s540_s15 = smov [#allocation5]   ;;  %s487_s19 = scalar_lea.hbm %s663_s5, 1024 }
  0x14   :  { %s40_s16 = sshll.u32 %s540_s15, 4  ;;  %p488_p8 = scmp.ne.s32.totalorder %s663_s5, %s487_s19  ;;  %s41_s16 = int_to_ptr.vmem [resolvable:$true] %s40_s16 }
  0x15   :  { %p491_p9 = scmp.lt.u32.totalorder %s487_s19, %s663_s5 }
  0x17   :  { %p493_p10 = pnand %p491_p9, %p488_p8 }
  0x19   :  { %496 = shalt.err (!%p493_p10)
}
  0x1a   :  { %s497_s24 = scalar_lea.vmem %s41_s16, 1024  ;;  %p502_p12 = scmp.lt.s32.totalorder %s41_s16, %s41_s16 }
  0x1b   :  { %p498_p11 = scmp.ne.s32.totalorder %s41_s16, %s497_s24  ;;  %p503_p13 = scmp.lt.s32.totalorder %s497_s24, %s497_s24 }
  0x1d   :  { %p504_p0 = por %p503_p13, %p502_p12 }
  0x1f   :  { %p505_p1 = pnand %p504_p0, %p498_p11 }
  0x21   :  { %508 = shalt.err (!%p505_p1)
}
  0x22   :  { %46 = dma.hbm_to_vmem [thread:$0]  %s663_s5, 1024, %s41_s16, [#allocation6], %s538_s11, %s538_s11, %s539_s12  }
  0x23   :  { %531 = dma.done.wait [#allocation3], 1024  }
  0x24   :  { %532 = vsyncadd [#allocation3], 4294966272 }
  0x25   :  { %533 = dma.done.wait [#allocation6], 1024  }
  0x26   :  { %534 = vsyncadd [#allocation6], 4294966272  ;;  %v541_v0 = vmov 0.0   ;;  %vm542_vm0 = vmmov 0   ;;  %vm69_vm1 = vcmask 1041408   ;;  %vm65_vm2 = vcmask 31744  }
  0x27   :  { %396 = vmatprep.subr.bf16.mxu0 %v541_v0  ;;  %398 = vmatprep.mubr.msk.bf16.mxu0 %vm542_vm0, %v541_v0  ;;  %v57_v1 = vld [vmem:[%s659_s1] sm:$0x3]  ;;  %v450_v5 = vld [vmem:[#allocation2 + $0x8] sm:$0xff]   ;;  %v451_v6 = vld [vmem:[#allocation2 + $0x10] sm:$0xff]   ;;  %s543_s9 = smov [#allocation7]  }
  0x28   :  { %402 = vmatprep.subr.bf16.mxu1 %v541_v0  ;;  %418 = vmatprep.mubr.msk.bf16.mxu1 %vm542_vm0, %v541_v0  ;;  %v71_v2 = vsel %vm69_vm1, %v57_v1, 0  ;;  %v449_v3 = vld [vmem:[#allocation2] sm:$0xff]   ;;  %v452_v7 = vld [vmem:[#allocation2 + $0x18] sm:$0xff]   ;;  %v454_v9 = vld [vmem:[#allocation2 + $0x28] sm:$0xff]   ;;  %s346_s10 = sshll.u32 %s543_s9, 4  ;;  %s347_s10 = int_to_ptr.vmem [resolvable:$true] %s346_s10 }
  0x29   :  { %397 = vmatpush3.bf16.msra.mxu0 %v71_v2  ;;  %v56_v4 = vld [vmem:[%s658_s0] sm:$0xf]  ;;  %403 = vmatpush3.bf16.msra.mxu1 %v449_v3  ;;  %v455_v10 = vld [vmem:[#allocation2 + $0x30] sm:$0xff]   ;;  %v456_v11 = vld [vmem:[#allocation2 + $0x38] sm:$0xff]   ;;  %p514_p3 = scmp.lt.s32.totalorder %s347_s10, %s347_s10 }
  0x2a   :  { %422 = vmatprep.subr.bf16.mxu0 %v541_v0  ;;  %404 = vmatprep.subr.bf16.mxu1 %v541_v0  ;;  %v453_v8 = vld [vmem:[#allocation2 + $0x20] sm:$0xff]   ;;  %v458_v13 = vld [vmem:[#allocation5 + $0x8] sm:$0xff]   ;;  %v459_v14 = vld [vmem:[#allocation5 + $0x10] sm:$0xff]  }
  0x2b   :  { %v457_v12 = vld [vmem:[#allocation5] sm:$0xff]   ;;  %v460_v15 = vld [vmem:[#allocation5 + $0x18] sm:$0xff]   ;;  %v462_v17 = vld [vmem:[#allocation5 + $0x28] sm:$0xff]  }
  0x2c   :  { %399 = vmatmul.mubr.msk.bf16.vlgmr.msra.gmra.mrb[0].mxu0 %vm65_vm2, %v56_v4  ;;  %v461_v16 = vld [vmem:[#allocation5 + $0x20] sm:$0xff]   ;;  %v463_v26 = vld [vmem:[#allocation5 + $0x30] sm:$0xff]   ;;  %v464_v27 = vld [vmem:[#allocation5 + $0x38] sm:$0xff]  }
  0x2d   :  { %438 = vmatprep.mubr.msk.bf16.mxu0 %vm542_vm0, %v541_v0  ;;  %405 = vmatpush3.bf16.msra.mxu1 %v450_v5  ;;  %v356_v18 = vld [vmem:[%s660_s2] ss:$0 sm:$0xff] }
  0x2e   :  { %406 = vmatprep.subr.bf16.mxu1 %v541_v0  ;;  %423 = vmatpush3.bf16.msra.mxu0 %v457_v12  ;;  %v358_v28 = vld [vmem:[%s662_s4] ss:$0 sm:$0xff]  ;;  %s509_s4 = scalar_lea.vmem %s347_s10, 128 }
  0x2f   :  { %424 = vmatprep.subr.bf16.mxu0 %v541_v0  ;;  %v367_v36 = vld [vmem:[%s664_s6] ss:$0 sm:$0xff]  ;;  %p510_p2 = scmp.ne.s32.totalorder %s347_s10, %s509_s4  ;;  %p515_p4 = scmp.lt.s32.totalorder %s509_s4, %s509_s4 }
  0x31   :  { %407 = vmatpush3.bf16.msra.mxu1 %v451_v6  ;;  %p516_p5 = por %p515_p4, %p514_p3 }
  0x32   :  { %408 = vmatprep.subr.bf16.mxu1 %v541_v0  ;;  %425 = vmatpush3.bf16.msra.mxu0 %v458_v13 }
  0x33   :  { %426 = vmatprep.subr.bf16.mxu0 %v541_v0  ;;  %p517_p6 = pnand %p516_p5, %p510_p2 }
  0x35   :  { %409 = vmatpush3.bf16.msra.mxu1 %v452_v7 }
  0x36   :  { %410 = vmatprep.subr.bf16.mxu1 %v541_v0  ;;  %427 = vmatpush3.bf16.msra.mxu0 %v459_v14 }
  0x37   :  { %428 = vmatprep.subr.bf16.mxu0 %v541_v0 }
  0x39   :  { %411 = vmatpush3.bf16.msra.mxu1 %v453_v8 }
  0x3a   :  { %412 = vmatprep.subr.bf16.mxu1 %v541_v0  ;;  %429 = vmatpush3.bf16.msra.mxu0 %v460_v15 }
  0x3b   :  { %430 = vmatprep.subr.bf16.mxu0 %v541_v0 }
  0x3d   :  { %413 = vmatpush3.bf16.msra.mxu1 %v454_v9 }
  0x3e   :  { %414 = vmatprep.subr.bf16.mxu1 %v541_v0  ;;  %431 = vmatpush3.bf16.msra.mxu0 %v461_v16 }
  0x3f   :  { %432 = vmatprep.subr.bf16.mxu0 %v541_v0 }
  0x41   :  { %415 = vmatpush3.bf16.msra.mxu1 %v455_v10 }
  0x42   :  { %416 = vmatprep.subr.bf16.mxu1 %v541_v0  ;;  %433 = vmatpush3.bf16.msra.mxu0 %v462_v17 }
  0x43   :  { %434 = vmatprep.subr.bf16.mxu0 %v541_v0 }
  0x45   :  { %417 = vmatpush3.bf16.msra.mxu1 %v456_v11 }
  0x46   :  { %435 = vmatpush3.bf16.msra.mxu0 %v463_v26 }
  0x47   :  { %436 = vmatprep.subr.bf16.mxu0 %v541_v0 }
  0x4a   :  { %437 = vmatpush3.bf16.msra.mxu0 %v464_v27 }
  0xff   :  { %v107_v19 = vpop.f32.mrb[0].mxu0 }
 0x100   :  { %v108_v20 = vadd.f32 %v356_v18, %v107_v19  ;;  %v400_v21 = vpop.f32.mrb[1].mxu0 }
 0x101   :  { %v110_v22 = vpop.f32.mrb[2].mxu0 }
 0x102   :  { %v113_v23 = vmax.f32 %v108_v20, 0.0  ;;  %v401_v24 = vpop.f32.mrb[3].mxu0 }
 0x104   :  { %v114_v25 = vpack.c.bf16 %v113_v23, %v113_v23 }
 0x106   :  { %419 = vmatmul.mubr.bf16.vlgmr.msra.gmra.mrb[0].mxu1 %v114_v25 }
 0x1d9   :  { %v220_v29 = vpop.f32.mrb[0].mxu1 }
 0x1da   :  { %v221_v30 = vadd.f32 %v358_v28, %v220_v29  ;;  %v420_v31 = vpop.f32.mrb[1].mxu1 }
 0x1db   :  { %v223_v32 = vpop.f32.mrb[2].mxu1 }
 0x1dc   :  { %v226_v33 = vmax.f32 %v221_v30, 0.0  ;;  %v421_v34 = vpop.f32.mrb[3].mxu1 }
 0x1de   :  { %v227_v35 = vpack.c.bf16 %v226_v33, %v226_v33 }
 0x1e0   :  { %439 = vmatmul.mubr.bf16.vlgmr.msra.gmra.mrb[4].mxu0 %v227_v35 }
 0x2b3   :  { %v333_v37 = vpop.f32.mrb[4].mxu0 }
 0x2b4   :  { %v334_v38 = vadd.f32 %v367_v36, %v333_v37  ;;  %v440_v39 = vpop.f32.mrb[5].mxu0 }
 0x2b5   :  { %v336_v40 = vpop.f32.mrb[6].mxu0 }
 0x2b6   :  { %339 = vst [vmem:[#allocation7] sm:$0xff] %v334_v38  ;;  %v441_v41 = vpop.f32.mrb[7].mxu0 }
 0x2b7   :  { %520 = shalt.err (!%p517_p6)
}
 0x2b8   :  { %s521_s6 = scalar_lea.hbm %s665_s7, 128 }
 0x2b9   :  { %p522_p7 = scmp.ne.s32.totalorder %s665_s7, %s521_s6  ;;  %p525_p8 = scmp.lt.u32.totalorder %s521_s6, %s665_s7 }
 0x2bb   :  { %p527_p9 = pnand %p525_p8, %p522_p7 }
 0x2bd   :  { %530 = shalt.err (!%p527_p9)
}
 0x2be   :  { %349 = dma.vmem_to_hbm [thread:$0]  %s347_s10, 128, %s665_s7, [#allocation4]  }
 0x2bf   :  { %535 = dma.done.wait [#allocation4], 128  }
 0x2c0   :  { %536 = vsyncadd [#allocation4], 4294967168 }
 0x2c1   :  { %353 = vsyncpa [#allocation3], 1 }
 0x2c2   :  { %354 = vsyncpa [#allocation6], 1 }
 0x2c3   :  { %355 = vsyncpa [#allocation4], 1 }

</bundles_post_ra>
